<compile_context>
chip_gen: v7x
topology: tpu7x:2x2x1
jax: 0.10.0
libtpu: 0.0.40
codegen_flags: <defaults>
</compile_context>

<pallas_src>
import jax
import jax.numpy as jnp
from jax.experimental import pallas as pl
from jax.experimental.pallas import tpu as pltpu

IN_FEATURES = 3
OUT_FEATURES = 3


def _linear_kernel(x_ref, wt_ref, b_ref, o_ref):
    # x_ref:  (B, 3)  int32  -> cast to f32 (matches x.to(torch.float))
    # wt_ref: (3, 3)  f32    (W^T)
    # b_ref:  (1, 3)  f32
    # o_ref:  (B, 3)  f32
    x = x_ref[...].astype(jnp.float32)
    wt = wt_ref[...]
    # 9 MACs: three unrolled VPU multiply-adds instead of an MXU push/pop.
    y = b_ref[...]
    y = y + x[:, 0:1] * wt[0:1, :]
    y = y + x[:, 1:2] * wt[1:2, :]
    y = y + x[:, 2:3] * wt[2:3, :]
    o_ref[...] = y


def prepare_linear_params(weight, bias):
    """One-time parameter prep (off the per-call path).

    weight: [out_features, in_features] f32 (PyTorch layout)
    bias:   [out_features] f32
    Returns (W^T as (3, 3) f32, bias as (1, 3) f32).
    """
    wt = jnp.asarray(weight, jnp.float32).T
    b2 = jnp.asarray(bias, jnp.float32).reshape(1, OUT_FEATURES)
    return wt, b2


@jax.jit
def linear_pallas(x_int, wt, b2):
    """x_int: [B, 3] int32; wt: (3, 3) f32 (W^T); b2: (1, 3) f32 -> [B, 3] f32."""
    B = x_int.shape[0]
    # Grid-free pallas_call: tiny full arrays resident in VMEM, body runs once.
    # No wrapper-side pad or slice — the hot path is exactly this custom call.
    return pl.pallas_call(
        _linear_kernel,
        out_shape=jax.ShapeDtypeStruct((B, OUT_FEATURES), jnp.float32),
        in_specs=[
            pl.BlockSpec(memory_space=pltpu.MemorySpace.VMEM),  # x (int32)
            pl.BlockSpec(memory_space=pltpu.MemorySpace.VMEM),  # W^T
            pl.BlockSpec(memory_space=pltpu.MemorySpace.VMEM),  # bias
        ],
        out_specs=pl.BlockSpec(memory_space=pltpu.MemorySpace.VMEM),
    )(x_int, wt, b2)


def init_linear_params(key):
    """Deterministic init matching nn.Linear(3, 3) shapes (Kaiming-uniform-ish)."""
    kw, kb = jax.random.split(key)
    bound = 1.0 / jnp.sqrt(jnp.float32(IN_FEATURES))
    weight = jax.random.uniform(
        kw, (OUT_FEATURES, IN_FEATURES), jnp.float32, -bound, bound
    )
    bias = jax.random.uniform(kb, (OUT_FEATURES,), jnp.float32, -bound, bound)
    return weight, bias


if __name__ == "__main__":
    key = jax.random.PRNGKey(0)
    k_param, k_input = jax.random.split(key)

    weight, bias = init_linear_params(k_param)
    wt, b2 = prepare_linear_params(weight, bias)  # one-time, off the hot path

    # Matches get_random_inputs(): torch.randint(100, [1, 3], dtype=torch.long).
    x = jax.random.randint(k_input, (1, IN_FEATURES), 0, 100, dtype=jnp.int32)

    y = linear_pallas(x, wt, b2)
    y = jax.block_until_ready(y)

    # Sanity check against plain-JAX reference.
    y_ref = x.astype(jnp.float32) @ weight.T + bias
    assert y.shape == (1, OUT_FEATURES)
    assert jnp.allclose(y, y_ref, atol=1e-5, rtol=1e-5)

    print("KERNEL_OK")
</pallas_src>

<mosaic_0001>
module attributes {stable_mosaic.version = 11 : i64} {
  func.func @_linear_kernel(%arg0: memref<1x3xi32, #tpu.memory_space<vmem>>, %arg1: memref<3x3xf32, #tpu.memory_space<vmem>>, %arg2: memref<1x3xf32, #tpu.memory_space<vmem>>, %arg3: memref<1x3xf32, #tpu.memory_space<vmem>>) attributes {dimension_semantics = [], scalar_prefetch = 0 : i64, scratch_operands = 0 : i64, tpu.core_type = #tpu.core_type<tc>} {
    %c0 = arith.constant 0 : index
    %c0_0 = arith.constant 0 : index
    %0 = vector.load %arg0[%c0, %c0_0] : memref<1x3xi32, #tpu.memory_space<vmem>>, vector<1x3xi32>
    %1 = arith.sitofp %0 : vector<1x3xi32> to vector<1x3xf32>
    %c0_1 = arith.constant 0 : index
    %c0_2 = arith.constant 0 : index
    %2 = vector.load %arg1[%c0_1, %c0_2] : memref<3x3xf32, #tpu.memory_space<vmem>>, vector<3x3xf32>
    %c0_3 = arith.constant 0 : index
    %c0_4 = arith.constant 0 : index
    %3 = vector.load %arg2[%c0_3, %c0_4] : memref<1x3xf32, #tpu.memory_space<vmem>>, vector<1x3xf32>
    %4 = vector.extract_strided_slice %1 {offsets = [0, 0], sizes = [1, 1], strides = [1, 1]} : vector<1x3xf32> to vector<1x1xf32>
    %5 = vector.extract_strided_slice %2 {offsets = [0, 0], sizes = [1, 3], strides = [1, 1]} : vector<3x3xf32> to vector<1x3xf32>
    %6 = vector.broadcast %4 : vector<1x1xf32> to vector<1x3xf32>
    %7 = arith.mulf %6, %5 : vector<1x3xf32>
    %8 = arith.addf %3, %7 : vector<1x3xf32>
    %9 = vector.extract_strided_slice %1 {offsets = [0, 1], sizes = [1, 1], strides = [1, 1]} : vector<1x3xf32> to vector<1x1xf32>
    %10 = vector.extract_strided_slice %2 {offsets = [1, 0], sizes = [1, 3], strides = [1, 1]} : vector<3x3xf32> to vector<1x3xf32>
    %11 = vector.broadcast %9 : vector<1x1xf32> to vector<1x3xf32>
    %12 = arith.mulf %11, %10 : vector<1x3xf32>
    %13 = arith.addf %8, %12 : vector<1x3xf32>
    %14 = vector.extract_strided_slice %1 {offsets = [0, 2], sizes = [1, 1], strides = [1, 1]} : vector<1x3xf32> to vector<1x1xf32>
    %15 = vector.extract_strided_slice %2 {offsets = [2, 0], sizes = [1, 3], strides = [1, 1]} : vector<3x3xf32> to vector<1x3xf32>
    %16 = vector.broadcast %14 : vector<1x1xf32> to vector<1x3xf32>
    %17 = arith.mulf %16, %15 : vector<1x3xf32>
    %18 = arith.addf %13, %17 : vector<1x3xf32>
    %c0_5 = arith.constant 0 : index
    %c0_6 = arith.constant 0 : index
    %19 = vector.load %arg3[%c0_5, %c0_6] : memref<1x3xf32, #tpu.memory_space<vmem>>, vector<1x3xf32>
    tpu.vector_store %arg3[%c0_5, %c0_6], %18 {strides = array<i32>} : memref<1x3xf32, #tpu.memory_space<vmem>>, vector<1x3xf32>,
    return
  }
}

</mosaic_0001>

<bundles_post_ra>
// kernel: linear_pallas.1
= control target key start
LH: loop header
LB: loop body
LE: loop exit
PB: predicated region body
PF: predicated region fallthrough
CT: control target
= control target key end

     0   :  { %8 = vsyncpa [#allocation3], 0  ;;  %s274_s0 = inlined_call_operand.hbm [shape: s32[1,3], index: 0, kind: input, shape index: {}]   ;;  %s275_s1 = inlined_call_operand.hbm [shape: f32[3,3], index: 1, kind: input, shape index: {}]   ;;  %s276_s2 = inlined_call_operand.vmem [shape: f32[1,3], index: 2, kind: input, shape index: {}]   ;;  %s277_s3 = inlined_call_operand.hbm [shape: f32[1,3], index: 3, kind: output, shape index: {}]  }
   0x1   :  { %9 = vsyncpa [#allocation6], 0 }
   0x2   :  { %10 = vsyncpa [#allocation4], 0  ;;  %s208_s12 = smov [#allocation2]   ;;  %s209_s14 = smov [#allocation5]  }
   0x3   :  { %s17_s13 = sshll.u32 %s208_s12, 4  ;;  %s27_s15 = sshll.u32 %s209_s14, 4  ;;  %s18_s13 = int_to_ptr.vmem [resolvable:$true] %s17_s13  ;;  %s28_s15 = int_to_ptr.vmem [resolvable:$true] %s27_s15 }
   0x4   :  { %s136_s18 = scalar_lea.hbm %s274_s0, 16 }
   0x5   :  { %p137_p0 = scmp.ne.s32.totalorder %s274_s0, %s136_s18  ;;  %p140_p1 = scmp.lt.u32.totalorder %s136_s18, %s274_s0 }
   0x7   :  { %p142_p2 = pnand %p140_p1, %p137_p0 }
   0x9   :  { %145 = shalt.err (!%p142_p2)
}
   0xa   :  { %s146_s23 = scalar_lea.vmem %s18_s13, 16  ;;  %s150_s24 = scalar_lea.vmem %s18_s13, 32 }
   0xb   :  { %p147_p3 = scmp.ne.s32.totalorder %s18_s13, %s146_s23  ;;  %p151_p4 = scmp.lt.s32.totalorder %s18_s13, %s18_s13 }
   0xc   :  { %p152_p5 = scmp.lt.s32.totalorder %s150_s24, %s146_s23 }
   0xe   :  { %p153_p6 = por %p152_p5, %p151_p4 }
  0x10   :  { %p154_p7 = pnand %p153_p6, %p147_p3 }
  0x12   :  { %157 = shalt.err (!%p154_p7)
}
  0x13   :  { %20 = dma.hbm_to_vmem [thread:$0]  %s274_s0, 16, %s18_s13, [#allocation3]  }
  0x14   :  { %s158_s29 = scalar_lea.hbm %s275_s1, 64 }
  0x15   :  { %p159_p8 = scmp.ne.s32.totalorder %s275_s1, %s158_s29  ;;  %p162_p9 = scmp.lt.u32.totalorder %s158_s29, %s275_s1 }
  0x17   :  { %p164_p10 = pnand %p162_p9, %p159_p8 }
  0x19   :  { %167 = shalt.err (!%p164_p10)
}
  0x1a   :  { %s168_s7 = scalar_lea.vmem %s28_s15, 64  ;;  %p173_p12 = scmp.lt.s32.totalorder %s28_s15, %s28_s15 }
  0x1b   :  { %p169_p11 = scmp.ne.s32.totalorder %s28_s15, %s168_s7  ;;  %p174_p13 = scmp.lt.s32.totalorder %s168_s7, %s168_s7 }
  0x1d   :  { %p175_p0 = por %p174_p13, %p173_p12 }
  0x1f   :  { %p176_p1 = pnand %p175_p0, %p169_p11 }
  0x21   :  { %179 = shalt.err (!%p176_p1)
}
  0x22   :  { %30 = dma.hbm_to_vmem [thread:$0]  %s275_s1, 64, %s28_s15, [#allocation6]  }
  0x23   :  { %202 = dma.done.wait [#allocation3], 16  }
  0x24   :  { %203 = vsyncadd [#allocation3], 4294967280 }
  0x25   :  { %204 = dma.done.wait [#allocation6], 64  }
  0x26   :  { %205 = vsyncadd [#allocation6], 4294967232  ;;  %v210_v0 = vmov 1   ;;  %v211_v1 = vmov 0   ;;  %v39_v2 = vld [vmem:[#allocation2] sm:$0x1]  ;;  %v48_v5 = vlaneseq }
  0x27   :  { %133 = vset.pattern.permute.xlu0 %v210_v0  ;;  %135 = vset.pattern.permute.xlu1 %v211_v1  ;;  %v40_v3 = vcvt.s32.f32 %v39_v2  ;;  %v212_v4 = vmov 2   ;;  %v213_v7 = vmov 1966171168   ;;  %v41_v11 = vld [vmem:[#allocation5] sm:$0x7]  ;;  %s214_s10 = smov [#allocation7]  }
  0x28   :  { %v49_v6 = vshrl.u32 %v48_v5, 7  ;;  %v65_v8 = vunpack.c.l.s4 %v213_v7  ;;  %v42_v23 = vld [vmem:[%s276_s2] sm:$0x1]  ;;  %s116_s11 = sshll.u32 %s214_s10, 4  ;;  %vm108_vm0 = vcmask 16384   ;;  %s117_s11 = int_to_ptr.vmem [resolvable:$true] %s116_s11 }
  0x29   :  { %55 = vperm.xlu0 %133, %v40_v3   ;;  %45 = vperm.xlu1 %135, %v40_v3   ;;  %s180_s12 = scalar_lea.vmem %s117_s11, 16  ;;  %s184_s13 = scalar_lea.vmem %s117_s11, 32 }
  0x2a   :  { %v50_v9 = vsub.s32 0, %v49_v6  ;;  %v66_v10 = vunpack.c.0.s8 %v65_v8  ;;  %p181_p2 = scmp.ne.s32.totalorder %s117_s11, %s180_s12  ;;  %p185_p3 = scmp.lt.s32.totalorder %s117_s11, %s117_s11 }
  0x2b   :  { %p186_p4 = scmp.lt.s32.totalorder %s184_s13, %s180_s12 }
  0x2c   :  { %v69_v14 = vsub.s32 %v66_v10, %v49_v6 }
  0x2d   :  { %134 = vset.pattern.permute.xlu0 %v212_v4  ;;  %p187_p5 = por %p186_p4, %p185_p3 }
  0x2e   :  { %82 = vperm.xlu0 %134, %v40_v3  }
  0x2f   :  { %p188_p6 = pnand %p187_p5, %p181_p2 }
  0xa8   :  { %v56_v12 = vpop.permute.xlu0 %55  ;;  %v46_v13 = vpop.permute.xlu1 %45 }
  0xa9   :  { %v61_v15 = vrot.slane %v56_v12, %v50_v9  ;;  %v51_v16 = vrot.slane %v46_v13, %v50_v9 }
  0xab   :  { %v62_v17 = vmul.f32 %v61_v15, %v41_v11  ;;  %v52_v20 = vmul.f32 %v51_v16, %v41_v11 }
  0xad   :  { %v70_v18 = vrot.slane %v62_v17, %v69_v14  ;;  %v83_v19 = vpop.permute.xlu0 %82  ;;  %v53_v26 = vadd.f32 %v52_v20, %v42_v23 }
  0xae   :  { %v88_v21 = vrot.slane %v83_v19, %v50_v9 }
  0xaf   :  { %v71_v22 = vcombine.high %v70_v18, %v70_v18 }
  0xb0   :  { %v89_v24 = vmul.f32 %v88_v21, %v41_v11 }
  0xb1   :  { %v78_v25 = vrot.slane %v71_v22, %v69_v14 }
  0xb2   :  { %v97_v27 = vrot.slane %v89_v24, %v69_v14 }
  0xb3   :  { %v80_v29 = vadd.f32 %v78_v25, %v53_v26 }
  0xb4   :  { %v104_v28 = vrot.slane %v97_v27, %v69_v14 }
  0xb6   :  { %v105_v30 = vcombine.high %v104_v28, %v104_v28 }
  0xb8   :  { %v107_v31 = vadd.f32 %v105_v30, %v80_v29 }
  0xba   :  { %109 = vst.msk [vmem:[#allocation7] sm:$0x1] %vm108_vm0, %v107_v31 }
  0xbb   :  { %191 = shalt.err (!%p188_p6)
}
  0xbc   :  { %s192_s15 = scalar_lea.hbm %s277_s3, 16 }
  0xbd   :  { %p193_p7 = scmp.ne.s32.totalorder %s277_s3, %s192_s15  ;;  %p196_p8 = scmp.lt.u32.totalorder %s192_s15, %s277_s3 }
  0xbf   :  { %p198_p9 = pnand %p196_p8, %p193_p7 }
  0xc1   :  { %201 = shalt.err (!%p198_p9)
}
  0xc2   :  { %119 = dma.vmem_to_hbm [thread:$0]  %s117_s11, 16, %s277_s3, [#allocation4]  }
  0xc3   :  { %206 = dma.done.wait [#allocation4], 16  }
  0xc4   :  { %207 = vsyncadd [#allocation4], 4294967280 }
  0xc5   :  { %123 = vsyncpa [#allocation3], 1 }
  0xc6   :  { %124 = vsyncpa [#allocation6], 1 }
  0xc7   :  { %125 = vsyncpa [#allocation4], 1 }

</bundles_post_ra>
